<compile_context>
chip_gen: v7x
topology: tpu7x:2x2x1
jax: 0.10.0
libtpu: 0.0.40
codegen_flags: <defaults>
</compile_context>

<pallas_src>
import functools

import jax
import jax.numpy as jnp
from jax import lax
from jax.experimental import pallas as pl
from jax.experimental.pallas import tpu as pltpu

LN_EPS = 1e-5


def _round_up(x, m):
    return ((x + m - 1) // m) * m


def _ln_relu(s, true_out_ch):
    """LayerNorm([out_ch], affine=False, eps=1e-5) + ReLU on an f32 tile.

    One-pass statistics; padded columns of `s` are exactly zero, so sums over
    the padded lane axis equal sums over the true out_ch channels.
    """
    inv_n = 1.0 / float(true_out_ch)
    row_sum = jnp.sum(s, axis=-1, keepdims=True)
    row_sum_sq = jnp.sum(s * s, axis=-1, keepdims=True)
    mean = row_sum * inv_n
    var = jnp.maximum(row_sum_sq * inv_n - mean * mean, 0.0)
    y = (s - mean) * lax.rsqrt(var + LN_EPS)
    return jnp.maximum(y, 0.0)


def _kernel_resident(obj_ref, x_ref, w_all_ref, b_all_ref, o_ref, *, true_out_ch):
    # obj_ref:   scalar-prefetch SMEM ref, shape (batch,)
    # x_ref:     (tile_n, in_ch_p)
    # w_all_ref: (num_objects, in_ch_p, out_ch_p)  whole table, VMEM-resident
    # b_all_ref: (num_objects, 1, out_ch_p)        whole table, VMEM-resident
    # o_ref:     (tile_n, out_ch_p)
    b = pl.program_id(0)
    obj = obj_ref[b]

    w = w_all_ref[obj]                               # (in_ch_p, out_ch_p)
    bias = b_all_ref[obj].astype(jnp.float32)        # (1, out_ch_p)

    # native-dtype MXU feed (bf16 fast path when inputs are bf16), f32 accum
    s = jnp.dot(x_ref[...], w, preferred_element_type=jnp.float32) + bias
    o_ref[...] = _ln_relu(s, true_out_ch).astype(o_ref.dtype)


def _kernel_lookup(order_ref, obj_ref, x_ref, w_ref, b_all_ref, o_ref, *, true_out_ch):
    # order_ref, obj_ref: scalar-prefetch SMEM refs, shape (batch,)
    # x_ref:     (tile_n, in_ch_p)
    # w_ref:     (in_ch_p, out_ch_p)      data-dependent block (pre-transposed)
    # b_all_ref: (num_objects, 1, out_ch_p)
    # o_ref:     (tile_n, out_ch_p)
    b = pl.program_id(0)
    obj = obj_ref[b]

    bias = b_all_ref[obj].astype(jnp.float32)        # (1, out_ch_p)
    s = jnp.dot(x_ref[...], w_ref[...], preferred_element_type=jnp.float32) + bias
    o_ref[...] = _ln_relu(s, true_out_ch).astype(o_ref.dtype)


def lookup_layer_forward(x, obj_idx, w_table, b_table, *, tile_n=None,
                         out_dtype=None, resident_table_bytes=4 << 20):
    """Apply the network returned by LookupLayer.forward(obj_idx) to x.

    x:        (batch, N, in_ch)            f32 or bf16
    obj_idx:  (batch,) int32
    w_table:  (num_objects, out_ch, in_ch) (PyTorch layout)
    b_table:  (num_objects, 1, out_ch)
    returns:  (batch, N, out_ch) in out_dtype (default: x.dtype)
    """
    batch, N, in_ch = x.shape
    num_objects, out_ch, in_ch_w = w_table.shape
    assert in_ch_w == in_ch
    out_dtype = x.dtype if out_dtype is None else out_dtype

    # --- lane-dense channel padding (multiples of 128 on the lane axis) -----
    in_ch_p = _round_up(in_ch, 128)
    out_ch_p = _round_up(out_ch, 128)

    # One-time HBM re-layout: contract on in_ch directly, out_ch on the lanes.
    w_t = jnp.swapaxes(w_table, -1, -2)              # (num_objects, in_ch, out_ch)
    if (in_ch_p, out_ch_p) != (in_ch, out_ch):
        w_t = jnp.pad(w_t, ((0, 0), (0, in_ch_p - in_ch), (0, out_ch_p - out_ch)))
    b_p = (jnp.pad(b_table, ((0, 0), (0, 0), (0, out_ch_p - out_ch)))
           if out_ch_p != out_ch else b_table)
    x_p = (jnp.pad(x, ((0, 0), (0, 0), (0, in_ch_p - in_ch)))
           if in_ch_p != in_ch else x)

    # --- VMEM budget / tile sizing ------------------------------------------
    x_isz = jnp.dtype(x_p.dtype).itemsize
    o_isz = jnp.dtype(out_dtype).itemsize
    w_isz = jnp.dtype(w_t.dtype).itemsize
    b_isz = jnp.dtype(b_p.dtype).itemsize

    table_bytes = num_objects * in_ch_p * out_ch_p * w_isz
    bias_bytes = num_objects * out_ch_p * b_isz
    use_resident = table_bytes <= resident_table_bytes
    resident_bytes = (table_bytes if use_resident
                      else 2 * in_ch_p * out_ch_p * w_isz) + bias_bytes

    if tile_n is None:
        # double-buffered x + out rows; keep the total under ~12 MiB so the
        # default scoped VMEM fits on v5e (16 MiB) and stays far under the
        # v7x 64 MiB physical / 32 MiB default-scoped budget.
        budget = 12 << 20
        per_row = 2 * (in_ch_p * x_isz + out_ch_p * o_isz)
        tile_n = max(8, min(8192, (budget - resident_bytes) // per_row))
    if tile_n >= N:
        tile_n = N
    else:
        tile_n = max(8, (tile_n // 8) * 8)
    n_tiles = pl.cdiv(N, tile_n)

    vmem_needed = resident_bytes + 2 * tile_n * (in_ch_p * x_isz + out_ch_p * o_isz)
    # Cap at 32 MiB: safe on all generations (v7x has only 64 MiB physical VMEM
    # per TensorCore); re-derive per generation if channels/tiles grow further.
    vmem_limit = int(min(max(2 * vmem_needed, 16 << 20), 32 << 20))

    obj_idx = obj_idx.astype(jnp.int32)

    if use_resident:
        # Small-table fast path: whole pre-transposed weight table resident in
        # VMEM (one DMA for the entire grid); no argsort / sorted-batch needed.
        kernel = functools.partial(_kernel_resident, true_out_ch=out_ch)
        grid_spec = pltpu.PrefetchScalarGridSpec(
            num_scalar_prefetch=1,
            grid=(batch, n_tiles),
            in_specs=[
                pl.BlockSpec((pl.Squeezed(), tile_n, in_ch_p),
                             lambda b, n, obj: (b, n, 0)),
                pl.BlockSpec((num_objects, in_ch_p, out_ch_p),
                             lambda b, n, obj: (0, 0, 0)),
                pl.BlockSpec((num_objects, 1, out_ch_p),
                             lambda b, n, obj: (0, 0, 0)),
            ],
            out_specs=pl.BlockSpec((pl.Squeezed(), tile_n, out_ch_p),
                                   lambda b, n, obj: (b, n, 0)),
        )
        args = (obj_idx, x_p, w_t, b_p)
        dims = ("parallel", "parallel")
    else:
        # Large-table path: visit the batch in obj-sorted order purely through
        # prefetched index_maps so consecutive equal weight-block indices dedup
        # the weight DMA.  Keep the sorted batch axis on one core ("arbitrary")
        # so megacore sharding (v7x) splits the N-tile axis instead.
        kernel = functools.partial(_kernel_lookup, true_out_ch=out_ch)
        order = jnp.argsort(obj_idx).astype(jnp.int32)
        sorted_obj = jnp.take(obj_idx, order).astype(jnp.int32)
        grid_spec = pltpu.PrefetchScalarGridSpec(
            num_scalar_prefetch=2,
            grid=(batch, n_tiles),
            in_specs=[
                pl.BlockSpec((pl.Squeezed(), tile_n, in_ch_p),
                             lambda b, n, order, obj: (order[b], n, 0)),
                pl.BlockSpec((pl.Squeezed(), in_ch_p, out_ch_p),
                             lambda b, n, order, obj: (obj[b], 0, 0)),
                pl.BlockSpec((num_objects, 1, out_ch_p),
                             lambda b, n, order, obj: (0, 0, 0)),
            ],
            out_specs=pl.BlockSpec((pl.Squeezed(), tile_n, out_ch_p),
                                   lambda b, n, order, obj: (order[b], n, 0)),
        )
        args = (order, sorted_obj, x_p, w_t, b_p)
        dims = ("arbitrary", "parallel")

    out_p = pl.pallas_call(
        kernel,
        out_shape=jax.ShapeDtypeStruct((batch, N, out_ch_p), out_dtype),
        grid_spec=grid_spec,
        compiler_params=pltpu.CompilerParams(
            dimension_semantics=dims,
            vmem_limit_bytes=vmem_limit),
    )(*args)

    return out_p[..., :out_ch] if out_ch_p != out_ch else out_p


def init_params(key, in_ch, out_ch, num_objects):
    """Matches LookupLinear.__init__: kaiming-normal weights, zero biases."""
    std = (2.0 / in_ch) ** 0.5   # kaiming_normal_(a=0, 'relu', fan_in)
    w_table = std * jax.random.normal(
        key, (num_objects, out_ch, in_ch), dtype=jnp.float32)
    b_table = jnp.zeros((num_objects, 1, out_ch), dtype=jnp.float32)
    return w_table, b_table


def reference_forward(x, obj_idx, w_table, b_table):
    """Pure-JAX reference of the same computation (f32, two-pass LN)."""
    w = w_table[obj_idx]                       # (batch, out_ch, in_ch)
    b = b_table[obj_idx]                       # (batch, 1, out_ch)
    s = jnp.einsum('bni,boi->bno', x.astype(jnp.float32), w.astype(jnp.float32),
                   precision=lax.Precision.HIGHEST) + b.astype(jnp.float32)
    mean = jnp.mean(s, axis=-1, keepdims=True)
    var = jnp.mean((s - mean) ** 2, axis=-1, keepdims=True)
    y = (s - mean) / jnp.sqrt(var + LN_EPS)
    return jnp.maximum(y, 0.0)


if __name__ == "__main__":
    in_ch, out_ch, num_objects = 32, 32, 4
    batch, N = 2, 8

    key = jax.random.PRNGKey(0)
    k_param, k_x, k_idx = jax.random.split(key, 3)

    w_table, b_table = init_params(k_param, in_ch, out_ch, num_objects)
    x = jax.random.normal(k_x, (batch, N, in_ch), dtype=jnp.float32)
    obj_idx = jax.random.randint(k_idx, (batch,), 0, num_objects,
                                 dtype=jnp.int32)

    ref = reference_forward(x, obj_idx, w_table, b_table)

    # 1) f32, small-table fast path (whole weight table VMEM-resident)
    out = jax.block_until_ready(
        lookup_layer_forward(x, obj_idx, w_table, b_table))
    assert out.shape == (batch, N, out_ch)
    max_err = jnp.max(jnp.abs(out - ref))
    assert jnp.allclose(out, ref, atol=5e-5, rtol=5e-5), (
        f"fast path max abs err {max_err}")

    # 2) f32, large-table path (data-dependent weight BlockSpec, sorted batch)
    out2 = jax.block_until_ready(
        lookup_layer_forward(x, obj_idx, w_table, b_table,
                             resident_table_bytes=0))
    max_err2 = jnp.max(jnp.abs(out2 - ref))
    assert jnp.allclose(out2, ref, atol=5e-5, rtol=5e-5), (
        f"lookup path max abs err {max_err2}")

    # 3) bf16 storage (bf16 MXU path, f32 LN math) — looser tolerance
    out_bf16 = jax.block_until_ready(
        lookup_layer_forward(x.astype(jnp.bfloat16), obj_idx,
                             w_table.astype(jnp.bfloat16),
                             b_table.astype(jnp.bfloat16),
                             out_dtype=jnp.bfloat16))
    max_err3 = jnp.max(jnp.abs(out_bf16.astype(jnp.float32) - ref))
    assert jnp.allclose(out_bf16.astype(jnp.float32), ref, atol=1e-1), (
        f"bf16 path max abs err {max_err3}")

    print("KERNEL_OK")
</pallas_src>

<mosaic_0001>
module attributes {stable_mosaic.version = 11 : i64} {
  func.func @_kernel_resident(%arg0: i32, %arg1: i32, %arg2: memref<2xi32, #tpu.memory_space<smem>>, %arg3: memref<1x8x128xf32, #tpu.memory_space<vmem>>, %arg4: memref<4x128x128xf32, #tpu.memory_space<vmem>>, %arg5: memref<4x1x128xf32, #tpu.memory_space<vmem>>, %arg6: memref<1x8x128xf32, #tpu.memory_space<vmem>>) attributes {dimension_semantics = [#tpu.dimension_semantics<parallel>, #tpu.dimension_semantics<parallel>], iteration_bounds = array<i64: 2, 1>, scalar_prefetch = 1 : i64, scratch_operands = 0 : i64, tpu.core_type = #tpu.core_type<tc>, window_params = [{transform_indices = @transform_0, window_bounds = array<i64: 1, 8, 128>}, {pipeline_mode = #tpu.pipeline_mode<synchronous>, transform_indices = @transform_1, window_bounds = array<i64: 4, 128, 128>}, {pipeline_mode = #tpu.pipeline_mode<synchronous>, transform_indices = @transform_2, window_bounds = array<i64: 4, 1, 128>}, {transform_indices = @transform_3, window_bounds = array<i64: 1, 8, 128>}]} {
    %0 = arith.index_cast %arg0 : i32 to index
    %1 = memref.load %arg2[%0] : memref<2xi32, #tpu.memory_space<smem>>
    %2 = arith.index_cast %1 : i32 to index
    %c0 = arith.constant 0 : index
    %c0_0 = arith.constant 0 : index
    %3 = vector.load %arg4[%2, %c0, %c0_0] : memref<4x128x128xf32, #tpu.memory_space<vmem>>, vector<1x128x128xf32>
    %4 = vector.shape_cast %3 : vector<1x128x128xf32> to vector<128x128xf32>
    %5 = arith.index_cast %1 : i32 to index
    %c0_1 = arith.constant 0 : index
    %c0_2 = arith.constant 0 : index
    %6 = vector.load %arg5[%5, %c0_1, %c0_2] : memref<4x1x128xf32, #tpu.memory_space<vmem>>, vector<1x1x128xf32>
    %7 = vector.shape_cast %6 : vector<1x1x128xf32> to vector<1x128xf32>
    %c0_3 = arith.constant 0 : index
    %c0_4 = arith.constant 0 : index
    %c0_5 = arith.constant 0 : index
    %8 = vector.load %arg3[%c0_3, %c0_4, %c0_5] : memref<1x8x128xf32, #tpu.memory_space<vmem>>, vector<1x8x128xf32>
    %9 = vector.shape_cast %8 : vector<1x8x128xf32> to vector<8x128xf32>
    %cst = arith.constant dense<0.000000e+00> : vector<8x128xf32>
    %10 = tpu.matmul %9, %4, %cst {dimension_numbers = #tpu.dot_dimension_numbers<[1], [0], [0], [1], [0, 0, 1, 1], [], []>} : vector<8x128xf32>, vector<128x128xf32>, vector<8x128xf32> -> vector<8x128xf32>
    %11 = vector.broadcast %7 : vector<1x128xf32> to vector<8x128xf32>
    %12 = arith.addf %10, %11 : vector<8x128xf32>
    %cst_6 = arith.constant dense<0.000000e+00> : vector<8xf32>
    %13 = vector.multi_reduction <add>, %12, %cst_6 [1] : vector<8x128xf32> to vector<8xf32>
    %14 = vector.shape_cast %13 : vector<8xf32> to vector<8x1xf32>
    %15 = arith.mulf %12, %12 : vector<8x128xf32>
    %cst_7 = arith.constant dense<0.000000e+00> : vector<8xf32>
    %16 = vector.multi_reduction <add>, %15, %cst_7 [1] : vector<8x128xf32> to vector<8xf32>
    %17 = vector.shape_cast %16 : vector<8xf32> to vector<8x1xf32>
    %cst_8 = arith.constant 3.125000e-02 : f32
    %18 = vector.broadcast %cst_8 : f32 to vector<8x1xf32>
    %19 = arith.mulf %14, %18 : vector<8x1xf32>
    %cst_9 = arith.constant 3.125000e-02 : f32
    %20 = vector.broadcast %cst_9 : f32 to vector<8x1xf32>
    %21 = arith.mulf %17, %20 : vector<8x1xf32>
    %22 = arith.mulf %19, %19 : vector<8x1xf32>
    %23 = arith.subf %21, %22 : vector<8x1xf32>
    %cst_10 = arith.constant 0.000000e+00 : f32
    %24 = vector.broadcast %cst_10 : f32 to vector<8x1xf32>
    %25 = arith.maximumf %23, %24 : vector<8x1xf32>
    %26 = vector.broadcast %19 : vector<8x1xf32> to vector<8x128xf32>
    %27 = arith.subf %12, %26 : vector<8x128xf32>
    %cst_11 = arith.constant 9.99999974E-6 : f32
    %28 = vector.broadcast %cst_11 : f32 to vector<8x1xf32>
    %29 = arith.addf %25, %28 : vector<8x1xf32>
    %30 = math.rsqrt %29 : vector<8x1xf32>
    %31 = vector.broadcast %30 : vector<8x1xf32> to vector<8x128xf32>
    %32 = arith.mulf %27, %31 : vector<8x128xf32>
    %cst_12 = arith.constant 0.000000e+00 : f32
    %33 = vector.broadcast %cst_12 : f32 to vector<8x128xf32>
    %34 = arith.maximumf %32, %33 : vector<8x128xf32>
    %c0_13 = arith.constant 0 : index
    %c0_14 = arith.constant 0 : index
    %c0_15 = arith.constant 0 : index
    %35 = vector.load %arg6[%c0_13, %c0_14, %c0_15] : memref<1x8x128xf32, #tpu.memory_space<vmem>>, vector<1x8x128xf32>
    %36 = vector.shape_cast %35 : vector<1x8x128xf32> to vector<8x128xf32>
    %37 = vector.shape_cast %34 : vector<8x128xf32> to vector<1x8x128xf32>
    tpu.vector_store %arg6[%c0_13, %c0_14, %c0_15], %37 {strides = array<i32>} : memref<1x8x128xf32, #tpu.memory_space<vmem>>, vector<1x8x128xf32>,
    return
  }
  func.func @transform_0(%arg0: i32, %arg1: i32, %arg2: memref<2xi32, #tpu.memory_space<smem>>) -> (i32, i32, i32) {
    %c0_i32 = arith.constant 0 : i32
    %c0_i32_0 = arith.constant 0 : i32
    return %arg0, %arg1, %c0_i32 : i32, i32, i32
  }
  func.func @transform_1(%arg0: i32, %arg1: i32, %arg2: memref<2xi32, #tpu.memory_space<smem>>) -> (i32, i32, i32) {
    %c0_i32 = arith.constant 0 : i32
    %c0_i32_0 = arith.constant 0 : i32
    %c0_i32_1 = arith.constant 0 : i32
    %c0_i32_2 = arith.constant 0 : i32
    return %c0_i32, %c0_i32_0, %c0_i32_1 : i32, i32, i32
  }
  func.func @transform_2(%arg0: i32, %arg1: i32, %arg2: memref<2xi32, #tpu.memory_space<smem>>) -> (i32, i32, i32) {
    %c0_i32 = arith.constant 0 : i32
    %c0_i32_0 = arith.constant 0 : i32
    %c0_i32_1 = arith.constant 0 : i32
    %c0_i32_2 = arith.constant 0 : i32
    return %c0_i32, %c0_i32_0, %c0_i32_1 : i32, i32, i32
  }
  func.func @transform_3(%arg0: i32, %arg1: i32, %arg2: memref<2xi32, #tpu.memory_space<smem>>) -> (i32, i32, i32) {
    %c0_i32 = arith.constant 0 : i32
    %c0_i32_0 = arith.constant 0 : i32
    return %arg0, %arg1, %c0_i32 : i32, i32, i32
  }
}

</mosaic_0001>

<bundles_post_ra>
// kernel: tpu_custom_call.1
= control target key start
LH: loop header
LB: loop body
LE: loop exit
PB: predicated region body
PF: predicated region fallthrough
CT: control target
= control target key end

     0   :  { %s1070_s0 = inlined_call_operand.hbm [shape: s32[2], index: 0, kind: input, shape index: {}]   ;;  %s1071_s1 = inlined_call_operand.hbm [shape: f32[2,8,128], index: 1, kind: input, shape index: {}]   ;;  %s1072_s2 = inlined_call_operand.hbm [shape: f32[4,128,128], index: 2, kind: input, shape index: {}]   ;;  %s1073_s3 = inlined_call_operand.vmem [shape: f32[4,1,128], index: 3, kind: input, shape index: {}]   ;;  %s1074_s4 = inlined_call_operand.hbm [shape: f32[2,8,128], index: 4, kind: output, shape index: {}]  }
   0x1   :  { %s619_s17 = scalar_lea.hbm %s1070_s0, 16 }
   0x2   :  { %p620_p0 = scmp.ne.s32.totalorder %s1070_s0, %s619_s17  ;;  %p623_p1 = scmp.lt.u32.totalorder %s619_s17, %s1070_s0 }
   0x4   :  { %p625_p2 = pnand %p623_p1, %p620_p0 }
   0x6   :  { %628 = shalt.err (!%p625_p2)  }
   0x7   :  { %s777_s22 = smov [#allocation3]  }
   0x8   :  { %10 = dma.hbm_to_smem %s1070_s0, 16, %s777_s22, [#allocation2] }
   0x9   :  { %739 = dma.done.wait [#allocation2], 16 }
   0xa   :  { %740 = vsyncadd [#allocation2], 4294967280 }
   0xb   :  { %12 = sfence }
   0xc   :  { %13 = vsyncpa [#allocation5], 0 }
   0xd   :  { %15 = vsyncpa [#allocation5 + $0x1], 0 }
   0xe   :  { %16 = vsyncpa [#allocation8], 0 }
   0xf   :  { %17 = vsyncpa [#allocation6], 0 }
  0x10   :  { %19 = vsyncpa [#allocation6 + $0x1], 0  ;;  %s823_s25 = smov 0   ;;  %s825_s26 = smov 0  }
  0x11   :  { %s827_s27 = smov 0   ;;  %s829_s28 = smov 0  }
  0x12   :  { %s831_s29 = smov 0   ;;  %s833_s30 = smov 0  }
  0x13 LB: > { %s445_s0 = sadd.s32 4294967295, %s775_s30   ;;  %s446_s5 = sadd.s32 4294967294, %s775_s30   ;;  %s775_s30 = sphi %s833_s30, %s25_s30   ;;  %s771_s29 = sphi %s831_s29, %s1098_s29   ;;  %s767_s28 = sphi %s829_s28, %s1097_s28   ;;  %s763_s27 = sphi %s827_s27, %s1096_s27   ;;  %s759_s26 = sphi %s825_s26, %s1095_s26   ;;  %s755_s25 = sphi %s823_s25, %s1094_s25  }
  0x14   : > { %p59_p3 = scmp.ne.s32.totalorder %s759_s26, %s755_s25  ;;  %p857_p4 = scmp.eq.s32.totalorder %s445_s0, 0 }
  0x15   : > { %p861_p5 = scmp.eq.s32.totalorder %s445_s0, 1  ;;  %p133_p6 = scmp.eq.s32.totalorder %s446_s5, 1 }
  0x16   : > { %s1079_s6 = scalar_select %p857_p4, 1, 0 }
  0x17   : > { %s1080_s7 = scalar_select %p861_p5, 1, 0 }
  0x18   : > { %p867_p7 = por %p857_p4, %p59_p3  ;;  %p447_p8 = scmp.ge.s32.totalorder %s775_s30, 1 }
  0x19   : > { %p872_p9 = por %p133_p6, %p59_p3  ;;  %p140_p10 = scmp.lt.s32.totalorder %s775_s30, 3 }
  0x1a   : > { %s1081_s8 = scalar_select %p867_p7, 1, 0 }
  0x1b   : > { %s1082_s9 = scalar_select %p872_p9, 1, 0 }
  0x1c   : > { %p877_p11 = pnand %p447_p8, %p140_p10  ;;  %s778_s11 = smov [#allocation7]  }
  0x1d   : > { %s152_s12 = sshll.u32 %s778_s11, 4  ;;  %s37_s14 = sadd.s32 1, %s771_s29  ;;  %s153_s12 = int_to_ptr.vmem [resolvable:$true] %s152_s12 }
  0x1e   : > { %s1083_s10 = scalar_select %p877_p11, 1, 0 }
  0x1f   : > { %p546_p12 = pneg %p877_p11  ;;  %s629_s17 = scalar_lea.hbm %s1072_s2, 8192 }
  0x20   : > { %p630_p1 = scmp.ne.s32.totalorder %s1072_s2, %s629_s17  ;;  %p636_p8 = scmp.lt.u32.totalorder %s629_s17, %s1072_s2 }
  0x21   : > { %p886_p0 = pnand %p546_p12, %p857_p4 }
  0x23   : > { %p631_p2 = pneg %p886_p0 }
  0x25   : > { %p632_p3 = pnand %p631_p2, %p630_p1 }
  0x27   : > { %p633_p6 = pneg %p632_p3 }
  0x29   : > { %p638_p10 = pnand %p636_p8, %p633_p6 }
  0x2b   : > { %641 = shalt.err (!%p638_p10)
}
  0x2c   : > { %s642_s22 = scalar_lea.vmem %s153_s12, 8192  ;;  %p650_p4 = scmp.lt.s32.totalorder %s153_s12, %s153_s12 }
  0x2d   : > { %p643_p12 = scmp.ne.s32.totalorder %s153_s12, %s642_s22  ;;  %p651_p7 = scmp.lt.s32.totalorder %s642_s22, %s642_s22 }
  0x2f   : > { %p645_p13 = pnand %p643_p12, %p631_p2  ;;  %p652_p11 = por %p651_p7, %p650_p4 }
  0x31   : > { %p646_p9 = pneg %p645_p13 }
  0x33   : > { %p653_p5 = pnand %p652_p11, %p646_p9 }
  0x35   : > { %656 = shalt.err (!%p653_p5)
}
  0x36   : > { %s779_s23 = smov 128   ;;  %s780_s24 = smov 8  }
  0x37   : > { %549 = dma.hbm_to_vmem [thread:$0]  (!%p886_p0), %s1072_s2, 8192, %s153_s12, [#allocation8], %s779_s23, %s779_s23, %s780_s24  }
  0x38   : > { %p39_p4 = scmp.ge.s32.totalorder %s37_s14, 2  ;;  %s46_s11 = sadd.s32 1, %s763_s27 }
  0x39   : > { %p53_p5 = scmp.ne.s32.totalorder %s763_s27, %s759_s26  ;;  %p54_p7 = scmp.eq.s32.totalorder %s775_s30, 0 }
  0x3a   : > { %s1100_s14 = smov (%p39_p4, %s37_s14), 0  ;;  %p1086_p11 = scmp.ne.s32.totalorder %s1080_s7, 0 }
  0x3b   : > { %p913_p9 = por %p54_p7, %p53_p5  ;;  %s41_s13 = ssub.s32 %s771_s29, %s1100_s14 }
  0x3c   : > { %p919_p13 = por %p1086_p11, %p53_p5  ;;  %p559_p1 = scmp.lt.s32.totalorder %s775_s30, 2 }
  0x3d   : > { %p44_p0 = scmp.eq.s32.totalorder %s41_s13, 0  ;;  %s169_s12 = sand.u32 1, %s763_s27  }
  0x3e   : > { %s450_s17 = sshll.u32 %s169_s12, 3  ;;  %s451_s19 = sshll.u32 %s771_s29, 7 }
  0x3f   : > { %s928_s18 = scalar_select %p44_p0, %s763_s27, %s46_s11  }
  0x40   : > { %s934_s22 = scalar_lea.hbm %s1071_s1, %s451_s19  ;;  %s173_s7 = scalar_lea.vmem [#allocation4], %s450_s17 }
  0x41   : > { %s181_s23 = sshll.u32 %s173_s7, 4  ;;  %p940_p2 = pnand %p559_p1, %p913_p9  ;;  %s936_s23 = int_to_ptr.vmem [resolvable:$true] %s181_s23 }
  0x42   : > { %s170_s0 = scalar_lea.sflag [#allocation5], %s169_s12  ;;  %s657_s5 = scalar_lea.hbm %s934_s22, 128 }
  0x43   : > { %p658_p3 = scmp.ne.s32.totalorder %s934_s22, %s657_s5  ;;  %p659_p6 = pneg %p940_p2 }
  0x44   : > { %s662_s17 = scalar_lea.hbm %s1071_s1, 256  ;;  %p663_p12 = scmp.lt.u32.totalorder %s934_s22, %s1071_s1 }
  0x45   : > { %p660_p8 = pnand %p659_p6, %p658_p3  ;;  %p664_p4 = scmp.lt.u32.totalorder %s662_s17, %s657_s5 }
  0x46   : > { %p666_p7 = scmp.lt.u32.totalorder %s657_s5, %s934_s22 }
  0x47   : > { %p661_p10 = pneg %p660_p8  ;;  %p665_p5 = por %p664_p4, %p663_p12 }
  0x49   : > { %p667_p9 = por %p666_p7, %p665_p5 }
  0x4b   : > { %p668_p11 = pnand %p667_p9, %p661_p10 }
  0x4d   : > { %671 = shalt.err (!%p668_p11)
}
  0x4e   : > { %s672_s12 = scalar_lea.vmem %s936_s23, 128  ;;  %s781_s20 = smov [#allocation4]  }
  0x4f   : > { %p673_p1 = scmp.ne.s32.totalorder %s936_s23, %s672_s12  ;;  %s677_s21 = sshll.u32 %s781_s20, 4  ;;  %s678_s21 = int_to_ptr.vmem [resolvable:$false] %s677_s21 }
  0x50   : > { %s679_s7 = scalar_lea.vmem %s678_s21, 256  ;;  %p680_p8 = scmp.lt.s32.totalorder %s936_s23, %s678_s21 }
  0x51   : > { %p675_p0 = pnand %p673_p1, %p659_p6  ;;  %p681_p12 = scmp.lt.s32.totalorder %s679_s7, %s672_s12 }
  0x53   : > { %p676_p3 = pneg %p675_p0  ;;  %p682_p4 = por %p681_p12, %p680_p8 }
  0x55   : > { %p683_p5 = pnand %p682_p4, %p676_p3 }
  0x57   : > { %686 = shalt.err (!%p683_p5)
}
  0x58   : > { %553 = dma.hbm_to_vmem [thread:$0]  (!%p940_p2), %s934_s22, 128, %s936_s23, %s170_s0  }
  0x59   : > { %p1089_p10 = scmp.ne.s32.totalorder %s1083_s10, 0 }
  0x5a   : > { %s972_s5 = sand.u32 (!%p1089_p10), 1, %s759_s26   ;;  %p1090_p6 = scmp.ne.s32.totalorder (!%p1089_p10), %s1081_s8, 0 }
  0x5b   : > { %190 = sbr.rel (%p1089_p10) target bundleno = 541 (0x21d), region = 32  ;;  %s453_s11 = sshll.u32 (!%p1089_p10), %s972_s5, 3 }
  0x5c   : > { %s193_s13 = scalar_lea.sflag (!%p1089_p10), [#allocation5], %s972_s5  ;;  %s978_s17 = scalar_lea.vmem (!%p1089_p10), [#allocation4], %s453_s11 }
  0x62   : > { %742 = dma.done.wait (%p1090_p6), %s193_s13, 128  }
  0x63   : > { %744 = vsyncadd (%p1090_p6), %s193_s13, 4294967168  ;;  %p1091_p2 = scmp.ne.s32.totalorder %s1079_s6, 0 }
  0x65   : > { %746 = dma.done.wait (%p1091_p2), [#allocation8], 8192  }
  0x66   : > { %748 = vsyncadd (%p1091_p2), [#allocation8], 4294959104  ;;  %v782_v0 = vmov 0.0|0.0   ;;  %s989_s10 = sld [smem:[#allocation3 + %s767_s28]]  ;;  %vm783_vm0 = vmmov 0   ;;  %v784_v1 = vmov 0.0  }
  0x67   : > { %514 = vmatprep.subr.bf16.mxu0 %v782_v0  ;;  %511 = vmatprep.mubr.msk.f32.mxu0 %vm783_vm0, %v784_v1  ;;  %v244_v26 = vld [vmem:[%s978_s17] sm:$0xff]  ;;  %s459_s0 = sshll.u32 %s767_s28, 7  ;;  %s222_s15 = scalar_lea.vmem [#allocation9], %s453_s11 }
  0x68   : > { %s352_s19 = sshll.u32 %s222_s15, 4  ;;  %s1021_s21 = scalar_lea.hbm %s1074_s4, %s459_s0  ;;  %s1023_s19 = int_to_ptr.vmem [resolvable:$true] %s352_s19 }
  0x69   : > { %s338_s7 = scalar_lea.sflag [#allocation6], %s972_s5  ;;  %s687_s13 = scalar_lea.vmem %s1023_s19, 128 }
  0x6a   : > { %p688_p7 = scmp.ne.s32.totalorder %s1023_s19, %s687_s13  ;;  %s785_s28 = smov [#allocation9]  }
  0x6b   : > { %s691_s11 = sshll.u32 %s785_s28, 4  ;;  %s692_s11 = int_to_ptr.vmem [resolvable:$false] %s691_s11 }
  0x6c   : > { %s456_s22 = sshll.u32 %s989_s10, 7  ;;  %s242_s24 = scalar_lea.vmem %s1073_s3, %s989_s10 }
  0x6d   : > { %s992_s23 = scalar_lea.vmem [#allocation7], %s456_s22  ;;  %v457_v27 = vld [vmem:[%s242_s24] ss:$0 sm:$0xff]  ;;  %p689_p9 = pnand %p688_p7, %p919_p13 }
  0x6e   : > { %v226_v2 = vld [vmem:[%s992_s23] sm:$0xff]  ;;  %v227_v3 = vld [vmem:[%s992_s23 + $0x8] sm:$0xff]  ;;  %v228_v4 = vld [vmem:[%s992_s23 + $0x10] sm:$0xff]  ;;  %s693_s17 = scalar_lea.vmem %s692_s11, 256  ;;  %p694_p1 = scmp.lt.s32.totalorder %s1023_s19, %s692_s11 }
  0x6f   : > { %v515_v5 = vpack.c.bf16 %v227_v3, %v226_v2  ;;  %v229_v6 = vld [vmem:[%s992_s23 + $0x18] sm:$0xff]  ;;  %v230_v8 = vld [vmem:[%s992_s23 + $0x20] sm:$0xff]  ;;  %v231_v9 = vld [vmem:[%s992_s23 + $0x28] sm:$0xff]  ;;  %p690_p11 = pneg %p689_p9  ;;  %p695_p0 = scmp.lt.s32.totalorder %s693_s17, %s687_s13 }
  0x70   : > { %v518_v7 = vpack.c.bf16 %v229_v6, %v228_v4  ;;  %v521_v10 = vpack.c.bf16 %v231_v9, %v230_v8  ;;  %v232_v11 = vld [vmem:[%s992_s23 + $0x30] sm:$0xff]  ;;  %v233_v12 = vld [vmem:[%s992_s23 + $0x38] sm:$0xff]  ;;  %v234_v14 = vld [vmem:[%s992_s23 + $0x40] sm:$0xff] }
  0x71   : > { %516 = vmatpush3.bf16.msra.mxu0 %v515_v5  ;;  %v524_v13 = vpack.c.bf16 %v233_v12, %v232_v11  ;;  %v235_v15 = vld [vmem:[%s992_s23 + $0x48] sm:$0xff]  ;;  %v236_v17 = vld [vmem:[%s992_s23 + $0x50] sm:$0xff]  ;;  %v237_v18 = vld [vmem:[%s992_s23 + $0x58] sm:$0xff]  ;;  %p696_p3 = por %p695_p0, %p694_p1 }
  0x72   : > { %517 = vmatprep.subr.bf16.mxu0 %v782_v0  ;;  %v527_v16 = vpack.c.bf16 %v235_v15, %v234_v14  ;;  %v530_v19 = vpack.c.bf16 %v237_v18, %v236_v17  ;;  %v238_v20 = vld [vmem:[%s992_s23 + $0x60] sm:$0xff]  ;;  %v239_v21 = vld [vmem:[%s992_s23 + $0x68] sm:$0xff]  ;;  %v240_v23 = vld [vmem:[%s992_s23 + $0x70] sm:$0xff] }
  0x73   : > { %v533_v22 = vpack.c.bf16 %v239_v21, %v238_v20  ;;  %v241_v24 = vld [vmem:[%s992_s23 + $0x78] sm:$0xff]  ;;  %p697_p8 = pnand %p696_p3, %p690_p11 }
  0x74   : > { %v536_v25 = vpack.c.bf16 %v241_v24, %v240_v23 }
  0x75   : > { %519 = vmatpush3.bf16.msra.mxu0 %v518_v7 }
  0x76   : > { %520 = vmatprep.subr.bf16.mxu0 %v782_v0 }
  0x79   : > { %522 = vmatpush3.bf16.msra.mxu0 %v521_v10 }
  0x7a   : > { %523 = vmatprep.subr.bf16.mxu0 %v782_v0 }
  0x7d   : > { %525 = vmatpush3.bf16.msra.mxu0 %v524_v13 }
  0x7e   : > { %526 = vmatprep.subr.bf16.mxu0 %v782_v0 }
  0x81   : > { %528 = vmatpush3.bf16.msra.mxu0 %v527_v16 }
  0x82   : > { %529 = vmatprep.subr.bf16.mxu0 %v782_v0 }
  0x85   : > { %531 = vmatpush3.bf16.msra.mxu0 %v530_v19 }
  0x86   : > { %532 = vmatprep.subr.bf16.mxu0 %v782_v0 }
  0x89   : > { %534 = vmatpush3.bf16.msra.mxu0 %v533_v22 }
  0x8a   : > { %535 = vmatprep.subr.bf16.mxu0 %v782_v0 }
  0x8d   : > { %537 = vmatpush3.bf16.msra.mxu0 %v536_v25 }
  0x90   : > { %512 = vmatmul.mubr.f32.vlgmr.msra.gmra.mrb[0].mxu0 %v244_v26 }
 0x163   : > { %v317_v28 = vpop.f32.mrb[0].mxu0 }
 0x164   : > { %v318_v29 = vadd.f32 %v457_v27, %v317_v28  ;;  %v513_v30 = vpop.f32.mrb[1].mxu0 }
 0x166   : > { %321 = vadd.xlane.f32.xlu0 %v318_v29  ;;  %v323_v31 = vmul.f32 %v318_v29, %v318_v29 }
 0x16a   : > { %324 = vadd.xlane.f32.xlu0 %v323_v31 }
 0x1f3   : > { %v322_v32 = vpop.xlane.xlu0 %321 }
 0x1f4   : > { %v326_v33 = vmul.f32 0.03125, %v322_v32 }
 0x1f6   : > { %v328_v35 = vmul.f32 %v326_v33, %v326_v33  ;;  %v331_v40 = vsub.f32 %v318_v29, %v326_v33 }
 0x1f7   : > { %v325_v34 = vpop.xlane.xlu0 %324 }
 0x1f8   : > { %v327_v36 = vmul.f32 0.03125, %v325_v34 }
 0x1fa   : > { %v329_v37 = vsub.f32 %v327_v36, %v328_v35 }
 0x1fc   : > { %v330_v38 = vmax.f32 %v329_v37, 0.0 }
 0x1fe   : > { %v332_v39 = vadd.f32 1e-05, %v330_v38 }
 0x200   : > { %617 = vrsqrt.f32 %v332_v39 }
 0x20a   : > { %v618_v41 = vpop.eup %617 }
 0x20b   : > { %v334_v42 = vmul.f32 %v618_v41, %v331_v40 }
 0x20d   : > { %v335_v43 = vmax.f32 %v334_v42, 0.0 }
 0x20f   : > { %336 = vst [vmem:[%s222_s15] sm:$0xff] %v335_v43 }
 0x210   : > { %700 = shalt.err (!%p697_p8)
}
 0x211   : > { %s701_s5 = scalar_lea.hbm %s1021_s21, 128  ;;  %s705_s23 = scalar_lea.hbm %s1074_s4, 256 }
 0x212   : > { %p702_p12 = scmp.ne.s32.totalorder %s1021_s21, %s701_s5  ;;  %p706_p10 = scmp.lt.u32.totalorder %s1021_s21, %s1074_s4 }
 0x213   : > { %p707_p6 = scmp.lt.u32.totalorder %s705_s23, %s701_s5  ;;  %p709_p7 = scmp.lt.u32.totalorder %s701_s5, %s1021_s21 }
 0x214   : > { %p703_p4 = pnand %p702_p12, %p919_p13 }
 0x215   : > { %p708_p2 = por %p707_p6, %p706_p10 }
 0x216   : > { %p704_p5 = pneg %p703_p4 }
 0x217   : > { %p710_p9 = por %p709_p7, %p708_p2 }
 0x219   : > { %p711_p11 = pnand %p710_p9, %p704_p5 }
 0x21b   : > { %714 = shalt.err (!%p711_p11)
}
 0x21c   : > { %544 = dma.vmem_to_hbm [thread:$0]  (%p919_p13), %s1023_s19, 128, %s1021_s21, %s338_s7  }
 0x21d PF: > { %s364_s24 = sand.u32 1, %s755_s25   ;;  %p1092_p1 = scmp.ne.s32.totalorder %s1082_s9, 0 }
 0x21e   : > { %p1093_p0 = scmp.ge.s32.totalorder %s775_s30, 2  ;;  %s365_s0 = scalar_lea.sflag [#allocation6], %s364_s24 }
 0x220   : > { %p555_p3 = pnand %p1093_p0, %p1092_p1 }
 0x222   : > { %750 = dma.done.wait (!%p555_p3), %s365_s0, 128  }
 0x223   : > { %752 = vsyncadd (!%p555_p3), %s365_s0, 4294967168  ;;  %s25_s30 = sadd.s32 1, %s775_s30   ;;  %s1094_s25 = smov %s759_s26 }
 0x224   : > { %p22_p8 = scmp.ge.s32.totalorder %s25_s30, 4   ;;  %s1095_s26 = smov %s763_s27 }
 0x225   : > { %s1096_s27 = smov %s928_s18  ;;  %s1097_s28 = smov %s771_s29 }
 0x226   : > { %s1098_s29 = smov %s1100_s14  ;;  %24 = sbr.rel (!%p22_p8) target bundleno = 19 (0x13), region = 83 }
 0x22d   :  { %370 = vsyncpa [#allocation5], 1 }
 0x22e   :  { %372 = vsyncpa [#allocation5 + $0x1], 1 }
 0x22f   :  { %373 = vsyncpa [#allocation8], 1 }
 0x230   :  { %374 = vsyncpa [#allocation6], 1 }
 0x231   :  { %376 = vsyncpa [#allocation6 + $0x1], 1 }

</bundles_post_ra>
